<compile_context>
chip_gen: v5e
topology: v5e:2x2
jax: 0.10.0
libtpu: 0.0.40
codegen_flags: <defaults>
</compile_context>

<pallas_src>
import functools

import jax
import jax.numpy as jnp
from jax.experimental import pallas as pl
from jax.experimental.pallas import tpu as pltpu

N_STATES = 4       # CartPole-v1 observation dim
N_ACTIONS = 2      # CartPole-v1 action dim
N_OUT_PAD = 8      # w2/b2 packed column count (sublane-friendly, tiny DMA)
HIDDEN = 128
MIN_GRID_STEPS = 4  # aim for >=4 row tiles so v7x's 2 TCs have work to split


def _round_up(n, m):
    return ((n + m - 1) // m) * m


def _cdiv(a, b):
    return -(-a // b)


def _mlp_kernel(x_ref, w1_ref, b1_ref, w2_ref, b2_ref, o_ref):
    """One row-tile of the MLP.

    x_ref : (B_t, 4)       f32
    w1_ref: (4, 128)       f32   (fc1 weight, transposed)
    b1_ref: (1, 128)       f32
    w2_ref: (128, 8)       f32   (out weight, transposed; cols [0:2] real)
    b2_ref: (1, 8)         f32   (cols [0:2] real)
    o_ref : (B_t, 2)       f32   (narrow output -> minimal HBM writeback)
    """
    x = x_ref[...]                      # (B_t, 4)
    w1 = w1_ref[...]                    # (4, 128)

    # fc1 on the VPU: K=4 broadcast multiply-adds (MXU stays free; neutral
    # while the kernel is DMA-bound).
    h = x[:, 0:1] * w1[0:1, :]
    h = h + x[:, 1:2] * w1[1:2, :]
    h = h + x[:, 2:3] * w1[2:3, :]
    h = h + x[:, 3:4] * w1[3:4, :]
    h = h + b1_ref[...]
    h = jnp.maximum(h, 0.0)             # ReLU, (B_t, 128)

    # Layer 2 on the (idle) MXU against the small packed weight.
    y = jnp.dot(h, w2_ref[...], preferred_element_type=jnp.float32)  # (B_t, 8)
    y = y + b2_ref[...]
    o_ref[...] = y[:, :N_ACTIONS].astype(o_ref.dtype)


def prepare_params(w1, b1, w2, b2):
    """Pack PyTorch-layout params (w1:(128,4), b1:(128,), w2:(2,128), b2:(2,))
    into the canonical kernel layout. Do this ONCE when params are created or
    updated -- not per forward call."""
    w1_t = jnp.asarray(w1, jnp.float32).T                        # (4, 128)
    b1_r = jnp.asarray(b1, jnp.float32).reshape(1, HIDDEN)       # (1, 128)
    w2_t = jnp.asarray(w2, jnp.float32).T                        # (128, 2)
    w2_p = jnp.zeros((HIDDEN, N_OUT_PAD), jnp.float32)
    w2_p = w2_p.at[:, :N_ACTIONS].set(w2_t)                      # (128, 8)
    b2_p = jnp.zeros((1, N_OUT_PAD), jnp.float32)
    b2_p = b2_p.at[0, :N_ACTIONS].set(jnp.asarray(b2, jnp.float32))
    return w1_t, b1_r, w2_p, b2_p


@functools.partial(jax.jit, static_argnames=("block_b",))
def dqn_net_forward(x, params, block_b=2048):
    """x: (B, 4) f32; params: output of prepare_params. Returns (B, 2) f32.

    Note: for tiny action-selection batches (B < ~64) launch overhead + weight
    DMA dominates; a plain fused XLA expression is equally good there. The
    packed 8-column w2 keeps the per-call HBM read ~5 KiB either way.
    """
    w1_t, b1_r, w2_p, b2_p = params
    B = x.shape[0]

    # Row tile: multiple of 8 (unmasked sublanes), sized so the grid has
    # >= MIN_GRID_STEPS steps when possible (v7x megacore), capped at block_b.
    bt = min(block_b, _round_up(max(_cdiv(B, MIN_GRID_STEPS), 1), 8))
    Bp = _round_up(B, bt)
    if Bp != B:
        x = jnp.pad(x, ((0, Bp - B), (0, 0)))

    grid = (Bp // bt,)

    out_padded = pl.pallas_call(
        _mlp_kernel,
        out_shape=jax.ShapeDtypeStruct((Bp, N_ACTIONS), jnp.float32),
        grid_spec=pltpu.PrefetchScalarGridSpec(
            num_scalar_prefetch=0,
            grid=grid,
            in_specs=[
                pl.BlockSpec((bt, N_STATES), lambda i: (i, 0)),      # x row tile
                pl.BlockSpec((N_STATES, HIDDEN), lambda i: (0, 0)),  # w1 resident
                pl.BlockSpec((1, HIDDEN), lambda i: (0, 0)),         # b1 resident
                pl.BlockSpec((HIDDEN, N_OUT_PAD), lambda i: (0, 0)), # w2 resident
                pl.BlockSpec((1, N_OUT_PAD), lambda i: (0, 0)),      # b2 resident
            ],
            out_specs=pl.BlockSpec((bt, N_ACTIONS), lambda i: (i, 0)),
        ),
        compiler_params=pltpu.CompilerParams(
            dimension_semantics=("parallel",),
        ),
    )(x, w1_t, b1_r, w2_p, b2_p)

    # Only batch padding (if any) needs trimming; columns are already exact.
    return out_padded[:B] if Bp != B else out_padded


def init_params(key):
    """Synthetic init mirroring the module's __init__: weights ~ N(0, 0.1);
    biases use PyTorch Linear default U(-1/sqrt(fan_in), 1/sqrt(fan_in))."""
    k1, k2, k3, k4 = jax.random.split(key, 4)
    w1 = 0.1 * jax.random.normal(k1, (HIDDEN, N_STATES), dtype=jnp.float32)
    w2 = 0.1 * jax.random.normal(k2, (N_ACTIONS, HIDDEN), dtype=jnp.float32)
    bound1 = 1.0 / jnp.sqrt(jnp.float32(N_STATES))
    bound2 = 1.0 / jnp.sqrt(jnp.float32(HIDDEN))
    b1 = jax.random.uniform(k3, (HIDDEN,), jnp.float32, -bound1, bound1)
    b2 = jax.random.uniform(k4, (N_ACTIONS,), jnp.float32, -bound2, bound2)
    return w1, b1, w2, b2


if __name__ == "__main__":
    key = jax.random.PRNGKey(0)
    kx, kp = jax.random.split(key)

    B = 8  # small batch of CartPole observations
    x = jax.random.normal(kx, (B, N_STATES), dtype=jnp.float32)
    w1, b1, w2, b2 = init_params(kp)

    params = prepare_params(w1, b1, w2, b2)   # packed once, reused per call
    out = dqn_net_forward(x, params)
    out = jax.block_until_ready(out)

    # Pure-JAX reference check of forward semantics (PyTorch layout math).
    ref = jnp.maximum(x @ w1.T + b1, 0.0) @ w2.T + b2
    assert out.shape == (B, N_ACTIONS)
    assert jnp.allclose(out, ref, atol=1e-5, rtol=1e-5)

    # Also exercise a non-multiple-of-8, multi-tile (>=4 grid steps) batch.
    B2 = 1000
    x2 = jax.random.normal(jax.random.PRNGKey(1), (B2, N_STATES), jnp.float32)
    out2 = jax.block_until_ready(dqn_net_forward(x2, params))
    ref2 = jnp.maximum(x2 @ w1.T + b1, 0.0) @ w2.T + b2
    assert out2.shape == (B2, N_ACTIONS)
    assert jnp.allclose(out2, ref2, atol=1e-5, rtol=1e-5)

    print("KERNEL_OK")
</pallas_src>

<mosaic_0001>
module attributes {stable_mosaic.version = 11 : i64} {
  func.func @_mlp_kernel(%arg0: i32, %arg1: memref<8x4xf32, #tpu.memory_space<vmem>>, %arg2: memref<4x128xf32, #tpu.memory_space<vmem>>, %arg3: memref<1x128xf32, #tpu.memory_space<vmem>>, %arg4: memref<128x8xf32, #tpu.memory_space<vmem>>, %arg5: memref<1x8xf32, #tpu.memory_space<vmem>>, %arg6: memref<8x2xf32, #tpu.memory_space<vmem>>) attributes {dimension_semantics = [#tpu.dimension_semantics<parallel>], iteration_bounds = array<i64: 1>, scalar_prefetch = 0 : i64, scratch_operands = 0 : i64, tpu.core_type = #tpu.core_type<tc>, window_params = [{transform_indices = @transform_0, window_bounds = array<i64: 8, 4>}, {pipeline_mode = #tpu.pipeline_mode<synchronous>, transform_indices = @transform_1, window_bounds = array<i64: 4, 128>}, {pipeline_mode = #tpu.pipeline_mode<synchronous>, transform_indices = @transform_2, window_bounds = array<i64: 1, 128>}, {pipeline_mode = #tpu.pipeline_mode<synchronous>, transform_indices = @transform_3, window_bounds = array<i64: 128, 8>}, {pipeline_mode = #tpu.pipeline_mode<synchronous>, transform_indices = @transform_4, window_bounds = array<i64: 1, 8>}, {transform_indices = @transform_5, window_bounds = array<i64: 8, 2>}]} {
    %c0 = arith.constant 0 : index
    %c0_0 = arith.constant 0 : index
    %0 = vector.load %arg1[%c0, %c0_0] : memref<8x4xf32, #tpu.memory_space<vmem>>, vector<8x4xf32>
    %c0_1 = arith.constant 0 : index
    %c0_2 = arith.constant 0 : index
    %1 = vector.load %arg2[%c0_1, %c0_2] : memref<4x128xf32, #tpu.memory_space<vmem>>, vector<4x128xf32>
    %2 = vector.extract_strided_slice %0 {offsets = [0, 0], sizes = [8, 1], strides = [1, 1]} : vector<8x4xf32> to vector<8x1xf32>
    %3 = vector.extract_strided_slice %1 {offsets = [0, 0], sizes = [1, 128], strides = [1, 1]} : vector<4x128xf32> to vector<1x128xf32>
    %4 = vector.broadcast %2 : vector<8x1xf32> to vector<8x128xf32>
    %5 = vector.broadcast %3 : vector<1x128xf32> to vector<8x128xf32>
    %6 = arith.mulf %4, %5 : vector<8x128xf32>
    %7 = vector.extract_strided_slice %0 {offsets = [0, 1], sizes = [8, 1], strides = [1, 1]} : vector<8x4xf32> to vector<8x1xf32>
    %8 = vector.extract_strided_slice %1 {offsets = [1, 0], sizes = [1, 128], strides = [1, 1]} : vector<4x128xf32> to vector<1x128xf32>
    %9 = vector.broadcast %7 : vector<8x1xf32> to vector<8x128xf32>
    %10 = vector.broadcast %8 : vector<1x128xf32> to vector<8x128xf32>
    %11 = arith.mulf %9, %10 : vector<8x128xf32>
    %12 = arith.addf %6, %11 : vector<8x128xf32>
    %13 = vector.extract_strided_slice %0 {offsets = [0, 2], sizes = [8, 1], strides = [1, 1]} : vector<8x4xf32> to vector<8x1xf32>
    %14 = vector.extract_strided_slice %1 {offsets = [2, 0], sizes = [1, 128], strides = [1, 1]} : vector<4x128xf32> to vector<1x128xf32>
    %15 = vector.broadcast %13 : vector<8x1xf32> to vector<8x128xf32>
    %16 = vector.broadcast %14 : vector<1x128xf32> to vector<8x128xf32>
    %17 = arith.mulf %15, %16 : vector<8x128xf32>
    %18 = arith.addf %12, %17 : vector<8x128xf32>
    %19 = vector.extract_strided_slice %0 {offsets = [0, 3], sizes = [8, 1], strides = [1, 1]} : vector<8x4xf32> to vector<8x1xf32>
    %20 = vector.extract_strided_slice %1 {offsets = [3, 0], sizes = [1, 128], strides = [1, 1]} : vector<4x128xf32> to vector<1x128xf32>
    %21 = vector.broadcast %19 : vector<8x1xf32> to vector<8x128xf32>
    %22 = vector.broadcast %20 : vector<1x128xf32> to vector<8x128xf32>
    %23 = arith.mulf %21, %22 : vector<8x128xf32>
    %24 = arith.addf %18, %23 : vector<8x128xf32>
    %c0_3 = arith.constant 0 : index
    %c0_4 = arith.constant 0 : index
    %25 = vector.load %arg3[%c0_3, %c0_4] : memref<1x128xf32, #tpu.memory_space<vmem>>, vector<1x128xf32>
    %26 = vector.broadcast %25 : vector<1x128xf32> to vector<8x128xf32>
    %27 = arith.addf %24, %26 : vector<8x128xf32>
    %cst = arith.constant 0.000000e+00 : f32
    %28 = vector.broadcast %cst : f32 to vector<8x128xf32>
    %29 = arith.maximumf %27, %28 : vector<8x128xf32>
    %c0_5 = arith.constant 0 : index
    %c0_6 = arith.constant 0 : index
    %30 = vector.load %arg4[%c0_5, %c0_6] : memref<128x8xf32, #tpu.memory_space<vmem>>, vector<128x8xf32>
    %cst_7 = arith.constant dense<0.000000e+00> : vector<8x8xf32>
    %31 = tpu.matmul %29, %30, %cst_7 {dimension_numbers = #tpu.dot_dimension_numbers<[1], [0], [0], [1], [0, 0, 1, 1], [], []>} : vector<8x128xf32>, vector<128x8xf32>, vector<8x8xf32> -> vector<8x8xf32>
    %c0_8 = arith.constant 0 : index
    %c0_9 = arith.constant 0 : index
    %32 = vector.load %arg5[%c0_8, %c0_9] : memref<1x8xf32, #tpu.memory_space<vmem>>, vector<1x8xf32>
    %33 = vector.broadcast %32 : vector<1x8xf32> to vector<8x8xf32>
    %34 = arith.addf %31, %33 : vector<8x8xf32>
    %35 = vector.extract_strided_slice %34 {offsets = [0, 0], sizes = [8, 2], strides = [1, 1]} : vector<8x8xf32> to vector<8x2xf32>
    %c0_10 = arith.constant 0 : index
    %c0_11 = arith.constant 0 : index
    %36 = vector.load %arg6[%c0_10, %c0_11] : memref<8x2xf32, #tpu.memory_space<vmem>>, vector<8x2xf32>
    tpu.vector_store %arg6[%c0_10, %c0_11], %35 {strides = array<i32>} : memref<8x2xf32, #tpu.memory_space<vmem>>, vector<8x2xf32>,
    return
  }
  func.func @transform_0(%arg0: i32) -> (i32, i32) {
    %c0_i32 = arith.constant 0 : i32
    %c0_i32_0 = arith.constant 0 : i32
    return %arg0, %c0_i32 : i32, i32
  }
  func.func @transform_1(%arg0: i32) -> (i32, i32) {
    %c0_i32 = arith.constant 0 : i32
    %c0_i32_0 = arith.constant 0 : i32
    %c0_i32_1 = arith.constant 0 : i32
    return %c0_i32, %c0_i32_0 : i32, i32
  }
  func.func @transform_2(%arg0: i32) -> (i32, i32) {
    %c0_i32 = arith.constant 0 : i32
    %c0_i32_0 = arith.constant 0 : i32
    %c0_i32_1 = arith.constant 0 : i32
    return %c0_i32, %c0_i32_0 : i32, i32
  }
  func.func @transform_3(%arg0: i32) -> (i32, i32) {
    %c0_i32 = arith.constant 0 : i32
    %c0_i32_0 = arith.constant 0 : i32
    %c0_i32_1 = arith.constant 0 : i32
    return %c0_i32, %c0_i32_0 : i32, i32
  }
  func.func @transform_4(%arg0: i32) -> (i32, i32) {
    %c0_i32 = arith.constant 0 : i32
    %c0_i32_0 = arith.constant 0 : i32
    %c0_i32_1 = arith.constant 0 : i32
    return %c0_i32, %c0_i32_0 : i32, i32
  }
  func.func @transform_5(%arg0: i32) -> (i32, i32) {
    %c0_i32 = arith.constant 0 : i32
    %c0_i32_0 = arith.constant 0 : i32
    return %arg0, %c0_i32 : i32, i32
  }
}

</mosaic_0001>

<bundles_post_ra>
// kernel: dqn_net_forward.1
= control target key start
LH: loop header
LB: loop body
LE: loop exit
PB: predicated region body
PF: predicated region fallthrough
CT: control target
= control target key end

     0   :  { %v113_v0 = vmov 0   ;;  %v114_v2 = vmov 2   ;;  %v115_v8 = vmov 1   ;;  %v116_v9 = vmov 3   ;;  %s210_s0 = inlined_call_operand.vmem [shape: f32[8,4], index: 0, kind: input, shape index: {}]   ;;  %s211_s3 = inlined_call_operand.vmem [shape: f32[128,8], index: 3, kind: input, shape index: {}]   ;;  %s212_s2 = inlined_call_operand.vmem [shape: f32[1,128], index: 2, kind: input, shape index: {}]   ;;  %s213_s4 = inlined_call_operand.vmem [shape: f32[1,8], index: 4, kind: input, shape index: {}]   ;;  %s214_s1 = inlined_call_operand.vmem [shape: f32[4,128], index: 1, kind: input, shape index: {}]   ;;  %s215_s5 = inlined_call_operand.vmem [shape: f32[8,2], index: 5, kind: output, shape index: {}]  }
   0x1   :  { %106 = vset.pattern.permute.xlu0 %v113_v0  ;;  %v20_v1 = vld [vmem:[%s210_s0] sm:$0xff]  ;;  %108 = vset.pattern.permute.xlu1 %v114_v2  ;;  %v71_v3 = vld [vmem:[%s211_s3 + $0x78] sm:$0xff]  ;;  %v70_v4 = vld [vmem:[%s211_s3 + $0x70] sm:$0xff]  ;;  %vm96_vm0 = vcmask 15360  }
   0x2   :  { %24 = vperm.xlu0 %106, %v20_v1   ;;  %37 = vperm.xlu1 %108, %v20_v1   ;;  %v69_v5 = vld [vmem:[%s211_s3 + $0x68] sm:$0xff]  ;;  %v68_v6 = vld [vmem:[%s211_s3 + $0x60] sm:$0xff]  ;;  %v67_v7 = vld [vmem:[%s211_s3 + $0x58] sm:$0xff] }
   0x3   :  { %76 = vmatpush.msra.mxu0 %v71_v3  ;;  %v66_v10 = vld [vmem:[%s211_s3 + $0x50] sm:$0xff]  ;;  %v65_v11 = vld [vmem:[%s211_s3 + $0x48] sm:$0xff]  ;;  %v64_v12 = vld [vmem:[%s211_s3 + $0x40] sm:$0xff] }
   0x4   :  { %v63_v13 = vld [vmem:[%s211_s3 + $0x38] sm:$0xff]  ;;  %v62_v14 = vld [vmem:[%s211_s3 + $0x30] sm:$0xff]  ;;  %v61_v15 = vld [vmem:[%s211_s3 + $0x28] sm:$0xff] }
   0x5   :  { %77 = vmatpush.msra.mxu0 %v70_v4  ;;  %v60_v16 = vld [vmem:[%s211_s3 + $0x20] sm:$0xff]  ;;  %v59_v17 = vld [vmem:[%s211_s3 + $0x18] sm:$0xff]  ;;  %v58_v18 = vld [vmem:[%s211_s3 + $0x10] sm:$0xff] }
   0x6   :  { %v57_v19 = vld [vmem:[%s211_s3 + $0x8] sm:$0xff]  ;;  %v56_v20 = vld [vmem:[%s211_s3] sm:$0xff] }
   0x7   :  { %78 = vmatpush.msra.mxu0 %v69_v5  ;;  %v21_v23 = vld [vmem:[%s214_s1] sm:$0xf] }
   0x8   :  { %v27_v24 = vperm.slane %v21_v23, 0  ;;  %v33_v25 = vperm.slane %v21_v23, 1  ;;  %v40_v26 = vperm.slane %v21_v23, 2  ;;  %v47_v27 = vperm.slane %v21_v23, 3  ;;  %v111_v36 = vld [vmem:[%s212_s2] ss:$0 sm:$0xff] }
   0x9   :  { %79 = vmatpush.msra.mxu0 %v68_v6  ;;  %v112_v40 = vld [vmem:[%s213_s4] ss:$0 sm:$0xff] }
   0xa   :  { %107 = vset.pattern.permute.xlu0 %v115_v8  ;;  %109 = vset.pattern.permute.xlu1 %v116_v9 }
   0xb   :  { %30 = vperm.xlu0 %107, %v20_v1   ;;  %44 = vperm.xlu1 %109, %v20_v1  }
   0xc   :  { %80 = vmatpush.msra.mxu0 %v67_v7 }
   0xe   :  { %81 = vmatpush.msra.mxu0 %v66_v10 }
  0x10   :  { %82 = vmatpush.msra.mxu0 %v65_v11 }
  0x12   :  { %83 = vmatpush.msra.mxu0 %v64_v12 }
  0x13   :  { %110 = vset.pattern.permute.xlu0 %v116_v9 }
  0x14   :  { %84 = vmatpush.msra.mxu0 %v63_v13 }
  0x16   :  { %85 = vmatpush.msra.mxu0 %v62_v14 }
  0x18   :  { %86 = vmatpush.msra.mxu0 %v61_v15 }
  0x1a   :  { %87 = vmatpush.msra.mxu0 %v60_v16 }
  0x1c   :  { %88 = vmatpush.msra.mxu0 %v59_v17 }
  0x1e   :  { %89 = vmatpush.msra.mxu0 %v58_v18 }
  0x20   :  { %90 = vmatpush.msra.mxu0 %v57_v19 }
  0x22   :  { %91 = vmatpush.msra.mxu0 %v56_v20 }
  0x74   :  { %v25_v21 = vpop.permute.xlu0 %24  ;;  %v38_v22 = vpop.permute.xlu1 %37 }
  0x75   :  { %v28_v30 = vmul.f32 %v27_v24, %v25_v21  ;;  %v41_v32 = vmul.f32 %v40_v26, %v38_v22 }
  0x7d   :  { %v31_v28 = vpop.permute.xlu0 %30  ;;  %v45_v29 = vpop.permute.xlu1 %44 }
  0x7e   :  { %v34_v31 = vmul.f32 %v33_v25, %v31_v28  ;;  %v48_v34 = vmul.f32 %v47_v27, %v45_v29 }
  0x80   :  { %v35_v33 = vadd.f32 %v34_v31, %v28_v30 }
  0x82   :  { %v42_v35 = vadd.f32 %v41_v32, %v35_v33 }
  0x84   :  { %v49_v37 = vadd.f32 %v48_v34, %v42_v35 }
  0x86   :  { %v54_v38 = vadd.f32 %v111_v36, %v49_v37 }
  0x88   :  { %v55_v39 = vmax.f32 %v54_v38, 0.0 }
  0x8a   :  { %92 = vmatmul.f32.vlgmr.msra.gmra.mxu0 %v55_v39 }
 0x107   :  { %v93_v41 = vpop.f32.mrf.mxu0 }
 0x108   :  { %v94_v42 = vadd.f32 %v112_v40, %v93_v41 }
 0x10a   :  { %97 = vst.msk [vmem:[%s215_s5] sm:$0xff] %vm96_vm0, %v94_v42 }

</bundles_post_ra>
